<compile_context>
chip_gen: v6e
topology: v6e:2x2x1
jax: 0.10.0
libtpu: 0.0.40
codegen_flags: <defaults>
</compile_context>

<pallas_src>
import jax
import jax.numpy as jnp
from jax.experimental import pallas as pl
from jax.experimental.pallas import tpu as pltpu


_VMEM_BUDGET = 48 * 1024 * 1024  # conservative across v5e/v6e (128 MiB) and v7x (64 MiB)


def _round_up(x: int, m: int) -> int:
    return ((x + m - 1) // m) * m


def _nbytes(a) -> int:
    return int(a.size) * jnp.dtype(a.dtype).itemsize


# --------------------------------------------------------------------------- #
# Kernel body: one batch tile of   relu(x @ W1 + b1) @ W2 + b2
# --------------------------------------------------------------------------- #
def simple_nn_kernel(x_ref, w1_ref, b1_ref, w2_ref, b2_ref, o_ref):
    # Linear 1 on the MXU (bf16 operands, f32 accumulation); bias + ReLU on
    # the VPU in f32.
    h = jnp.dot(x_ref[...], w1_ref[...], preferred_element_type=jnp.float32)
    h = jnp.maximum(h + b1_ref[...], 0.0)        # b1 is (1, hid_p) -> broadcast

    # Linear 2: feed the MXU in the weight dtype (bf16), accumulate f32.
    out = jnp.dot(h.astype(w2_ref.dtype), w2_ref[...],
                  preferred_element_type=jnp.float32)
    o_ref[...] = (out + b2_ref[...]).astype(o_ref.dtype)


# --------------------------------------------------------------------------- #
# One-time parameter preparation (lane padding + bf16 cast), outside hot path.
# --------------------------------------------------------------------------- #
def prepare_params(w1, b1, w2, b2, compute_dtype=jnp.bfloat16):
    """w1: [in, hidden], b1: [1, hidden], w2: [hidden, classes], b2: [1, classes]."""
    in_f, hidden = w1.shape
    num_classes = w2.shape[1]
    hid_p = _round_up(hidden, 128)
    cls_p = _round_up(num_classes, 128)

    w1p = jnp.zeros((in_f, hid_p), compute_dtype).at[:, :hidden].set(
        w1.astype(compute_dtype))
    b1p = jnp.zeros((1, hid_p), jnp.float32).at[:, :hidden].set(
        b1.astype(jnp.float32).reshape(1, -1))
    w2p = jnp.zeros((hid_p, cls_p), compute_dtype).at[:hidden, :num_classes].set(
        w2.astype(compute_dtype))
    b2p = jnp.zeros((1, cls_p), jnp.float32).at[:, :num_classes].set(
        b2.astype(jnp.float32).reshape(1, -1))
    return (w1p, b1p, w2p, b2p), num_classes


def _choose_block_batch(B, in_f, hid_p, cls_p, resident_weight_bytes):
    """Batch tile: fits the VMEM budget, divides the padded batch, >=2 grid steps
    when possible (v7x megacore)."""
    B_pad = _round_up(B, 8)
    # Per-row VMEM cost: 2x double-buffered bf16 x tile, 2x double-buffered f32
    # out tile, plus the f32 + bf16 hidden intermediates.
    per_row = 2 * in_f * 2 + 2 * cls_p * 4 + hid_p * (4 + 2)
    avail = _VMEM_BUDGET - resident_weight_bytes - (2 << 20)  # 2 MiB slack
    cap = max(8, min(1024, (avail // per_row) // 8 * 8))
    if B_pad <= cap:
        if B_pad >= 16:
            return _round_up((B_pad + 1) // 2, 8)   # guarantee >= 2 grid steps
        return B_pad
    # Largest multiple-of-8 tile <= cap that divides B_pad (avoid a mostly-padded tail).
    for tb in range(cap, 7, -8):
        if B_pad % tb == 0:
            return tb
    return cap


# --------------------------------------------------------------------------- #
# Forward wrapper
# --------------------------------------------------------------------------- #
def simple_nn_forward(x, padded_params, num_classes, *, block_batch=None,
                      out_dtype=None):
    """x: [B, input_size] (any float dtype).  Returns [B, num_classes]."""
    w1p, b1p, w2p, b2p = padded_params
    B, in_f = x.shape
    hid_p = w1p.shape[1]
    cls_p = w2p.shape[1]
    out_dtype = jnp.dtype(out_dtype or x.dtype)
    compute_dtype = w1p.dtype

    # Cast the activation stream to the MXU dtype at the call boundary
    # (halves x's HBM bytes; no zero-padded copy of x is ever materialized).
    xc = x.astype(compute_dtype)

    weight_bytes = (_nbytes(w1p) + _nbytes(b1p) + _nbytes(w2p) + _nbytes(b2p))
    if 2 * weight_bytes > _VMEM_BUDGET:
        # TODO(synk): add a hidden-dim (K)-tiled reduction path ('arbitrary' grid
        # axis + f32 VMEM accumulator + pl.when init/finalize) for MLPs whose
        # resident weights exceed the per-generation VMEM budget.
        raise NotImplementedError("resident-weight design exceeds the VMEM budget")

    if block_batch is None:
        TB = _choose_block_batch(B, in_f, hid_p, cls_p, 2 * weight_bytes)
    else:
        TB = _round_up(block_batch, 8)
    grid = (pl.cdiv(B, TB),)

    cost = pl.CostEstimate(
        flops=2 * B * (in_f * hid_p + hid_p * cls_p),
        transcendentals=0,
        bytes_accessed=int(_nbytes(xc) + weight_bytes
                           + B * cls_p * out_dtype.itemsize),
    )

    def run(weight_mode):
        wkw = {} if weight_mode is None else {"pipeline_mode": weight_mode}
        call = pl.pallas_call(
            simple_nn_kernel,
            out_shape=jax.ShapeDtypeStruct((B, cls_p), out_dtype),
            grid_spec=pl.GridSpec(
                grid=grid,
                in_specs=[
                    pl.BlockSpec((TB, in_f), lambda i: (i, 0)),         # x: streamed
                    pl.BlockSpec((in_f, hid_p), lambda i: (0, 0), **wkw),   # W1: resident
                    pl.BlockSpec((1, hid_p), lambda i: (0, 0), **wkw),      # b1: resident
                    pl.BlockSpec((hid_p, cls_p), lambda i: (0, 0), **wkw),  # W2: resident
                    pl.BlockSpec((1, cls_p), lambda i: (0, 0), **wkw),      # b2: resident
                ],
                out_specs=pl.BlockSpec((TB, cls_p), lambda i: (i, 0)),  # lane-dense out
            ),
            compiler_params=pltpu.CompilerParams(
                dimension_semantics=("parallel",),        # megacore sharding on v7x
                vmem_limit_bytes=_VMEM_BUDGET,
            ),
            cost_estimate=cost,
        )
        return call(xc, w1p, b1p, w2p, b2p)

    weight_mode = pl.Buffered(1) if hasattr(pl, "Buffered") else None
    if weight_mode is None:
        out_p = run(None)
    else:
        try:
            out_p = run(weight_mode)     # single-buffer the constant weight tiles
        except Exception:
            out_p = run(None)            # fall back to default double-buffering

    # Strip class-lane padding (batch was never padded).
    return out_p[:, :num_classes]


# --------------------------------------------------------------------------- #
# Deterministic init mimicking nn.Linear's U(-1/sqrt(fan_in), 1/sqrt(fan_in)).
# --------------------------------------------------------------------------- #
def init_params(key, input_size, hidden_size, num_classes, dtype=jnp.float32):
    k1, k2, k3, k4 = jax.random.split(key, 4)
    bound1 = 1.0 / jnp.sqrt(input_size)
    bound2 = 1.0 / jnp.sqrt(hidden_size)
    # Stored transposed relative to PyTorch: [in, out].
    w1 = jax.random.uniform(k1, (input_size, hidden_size), dtype,
                            minval=-bound1, maxval=bound1)
    b1 = jax.random.uniform(k2, (1, hidden_size), dtype,
                            minval=-bound1, maxval=bound1)
    w2 = jax.random.uniform(k3, (hidden_size, num_classes), dtype,
                            minval=-bound2, maxval=bound2)
    b2 = jax.random.uniform(k4, (1, num_classes), dtype,
                            minval=-bound2, maxval=bound2)
    return w1, b1, w2, b2


if __name__ == "__main__":
    input_size, hidden_size, num_classes = 16, 32, 8
    batch = 16   # -> 2 batch-grid steps (exercises pipelining + v7x megacore path)

    key = jax.random.PRNGKey(0)
    kx, kp = jax.random.split(key)
    x = jax.random.normal(kx, (batch, input_size), dtype=jnp.float32)
    w1, b1, w2, b2 = init_params(kp, input_size, hidden_size, num_classes)
    padded_params, _ = prepare_params(w1, b1, w2, b2)

    out = simple_nn_forward(x, padded_params, num_classes)
    out = jax.block_until_ready(out)
    assert out.shape == (batch, num_classes)
    assert out.dtype == x.dtype

    # Reference matching the kernel's dtype plan (bf16 operands, f32 accumulation).
    xb, w1b, w2b = (a.astype(jnp.bfloat16) for a in (x, w1, w2))
    h_ref = jnp.maximum(jnp.dot(xb, w1b, preferred_element_type=jnp.float32)
                        + b1.astype(jnp.float32), 0.0)
    ref = (jnp.dot(h_ref.astype(jnp.bfloat16), w2b,
                   preferred_element_type=jnp.float32)
           + b2.astype(jnp.float32))
    assert jnp.allclose(out, ref, atol=2e-3, rtol=2e-3)

    # Coarse check against the original module's full-f32 math.
    ref_f32 = jnp.maximum(x @ w1 + b1, 0.0) @ w2 + b2
    assert jnp.allclose(out, ref_f32, atol=5e-2, rtol=5e-2)

    print("KERNEL_OK")
</pallas_src>

<mosaic_0001>
module attributes {stable_mosaic.version = 11 : i64} {
  func.func @simple_nn_kernel(%arg0: i32, %arg1: memref<8x16xbf16, #tpu.memory_space<vmem>>, %arg2: memref<16x128xbf16, #tpu.memory_space<vmem>>, %arg3: memref<1x128xf32, #tpu.memory_space<vmem>>, %arg4: memref<128x128xbf16, #tpu.memory_space<vmem>>, %arg5: memref<1x128xf32, #tpu.memory_space<vmem>>, %arg6: memref<8x128xf32, #tpu.memory_space<vmem>>) attributes {dimension_semantics = [#tpu.dimension_semantics<parallel>], iteration_bounds = array<i64: 2>, scalar_prefetch = 0 : i64, scratch_operands = 0 : i64, tpu.core_type = #tpu.core_type<tc>, window_params = [{transform_indices = @transform_0, window_bounds = array<i64: 8, 16>}, {pipeline_mode = #tpu.pipeline_mode<synchronous>, transform_indices = @transform_1, window_bounds = array<i64: 16, 128>}, {pipeline_mode = #tpu.pipeline_mode<synchronous>, transform_indices = @transform_2, window_bounds = array<i64: 1, 128>}, {pipeline_mode = #tpu.pipeline_mode<synchronous>, transform_indices = @transform_3, window_bounds = array<i64: 128, 128>}, {pipeline_mode = #tpu.pipeline_mode<synchronous>, transform_indices = @transform_4, window_bounds = array<i64: 1, 128>}, {transform_indices = @transform_5, window_bounds = array<i64: 8, 128>}]} {
    %c0 = arith.constant 0 : index
    %c0_0 = arith.constant 0 : index
    %0 = vector.load %arg1[%c0, %c0_0] : memref<8x16xbf16, #tpu.memory_space<vmem>>, vector<8x16xbf16>
    %c0_1 = arith.constant 0 : index
    %c0_2 = arith.constant 0 : index
    %1 = vector.load %arg2[%c0_1, %c0_2] : memref<16x128xbf16, #tpu.memory_space<vmem>>, vector<16x128xbf16>
    %cst = arith.constant dense<0.000000e+00> : vector<8x128xf32>
    %2 = tpu.matmul %0, %1, %cst {dimension_numbers = #tpu.dot_dimension_numbers<[1], [0], [0], [1], [0, 0, 1, 1], [], []>} : vector<8x16xbf16>, vector<16x128xbf16>, vector<8x128xf32> -> vector<8x128xf32>
    %c0_3 = arith.constant 0 : index
    %c0_4 = arith.constant 0 : index
    %3 = vector.load %arg3[%c0_3, %c0_4] : memref<1x128xf32, #tpu.memory_space<vmem>>, vector<1x128xf32>
    %4 = vector.broadcast %3 : vector<1x128xf32> to vector<8x128xf32>
    %5 = arith.addf %2, %4 : vector<8x128xf32>
    %cst_5 = arith.constant 0.000000e+00 : f32
    %6 = vector.broadcast %cst_5 : f32 to vector<8x128xf32>
    %7 = arith.maximumf %5, %6 : vector<8x128xf32>
    %8 = arith.truncf %7 : vector<8x128xf32> to vector<8x128xbf16>
    %c0_6 = arith.constant 0 : index
    %c0_7 = arith.constant 0 : index
    %9 = vector.load %arg4[%c0_6, %c0_7] : memref<128x128xbf16, #tpu.memory_space<vmem>>, vector<128x128xbf16>
    %cst_8 = arith.constant dense<0.000000e+00> : vector<8x128xf32>
    %10 = tpu.matmul %8, %9, %cst_8 {dimension_numbers = #tpu.dot_dimension_numbers<[1], [0], [0], [1], [0, 0, 1, 1], [], []>} : vector<8x128xbf16>, vector<128x128xbf16>, vector<8x128xf32> -> vector<8x128xf32>
    %c0_9 = arith.constant 0 : index
    %c0_10 = arith.constant 0 : index
    %11 = vector.load %arg5[%c0_9, %c0_10] : memref<1x128xf32, #tpu.memory_space<vmem>>, vector<1x128xf32>
    %12 = vector.broadcast %11 : vector<1x128xf32> to vector<8x128xf32>
    %13 = arith.addf %10, %12 : vector<8x128xf32>
    %c0_11 = arith.constant 0 : index
    %c0_12 = arith.constant 0 : index
    %14 = vector.load %arg6[%c0_11, %c0_12] : memref<8x128xf32, #tpu.memory_space<vmem>>, vector<8x128xf32>
    tpu.vector_store %arg6[%c0_11, %c0_12], %13 {strides = array<i32>} : memref<8x128xf32, #tpu.memory_space<vmem>>, vector<8x128xf32>,
    return
  }
  func.func @transform_0(%arg0: i32) -> (i32, i32) {
    %c0_i32 = arith.constant 0 : i32
    %c0_i32_0 = arith.constant 0 : i32
    return %arg0, %c0_i32 : i32, i32
  }
  func.func @transform_1(%arg0: i32) -> (i32, i32) {
    %c0_i32 = arith.constant 0 : i32
    %c0_i32_0 = arith.constant 0 : i32
    %c0_i32_1 = arith.constant 0 : i32
    return %c0_i32, %c0_i32_0 : i32, i32
  }
  func.func @transform_2(%arg0: i32) -> (i32, i32) {
    %c0_i32 = arith.constant 0 : i32
    %c0_i32_0 = arith.constant 0 : i32
    %c0_i32_1 = arith.constant 0 : i32
    return %c0_i32, %c0_i32_0 : i32, i32
  }
  func.func @transform_3(%arg0: i32) -> (i32, i32) {
    %c0_i32 = arith.constant 0 : i32
    %c0_i32_0 = arith.constant 0 : i32
    %c0_i32_1 = arith.constant 0 : i32
    return %c0_i32, %c0_i32_0 : i32, i32
  }
  func.func @transform_4(%arg0: i32) -> (i32, i32) {
    %c0_i32 = arith.constant 0 : i32
    %c0_i32_0 = arith.constant 0 : i32
    %c0_i32_1 = arith.constant 0 : i32
    return %c0_i32, %c0_i32_0 : i32, i32
  }
  func.func @transform_5(%arg0: i32) -> (i32, i32) {
    %c0_i32 = arith.constant 0 : i32
    %c0_i32_0 = arith.constant 0 : i32
    return %arg0, %c0_i32 : i32, i32
  }
}

module attributes {stable_mosaic.version = 11 : i64} {
  func.func @simple_nn_kernel(%arg0: i32, %arg1: memref<8x16xbf16, #tpu.memory_space<vmem>>, %arg2: memref<16x128xbf16, #tpu.memory_space<vmem>>, %arg3: memref<1x128xf32, #tpu.memory_space<vmem>>, %arg4: memref<128x128xbf16, #tpu.memory_space<vmem>>, %arg5: memref<1x128xf32, #tpu.memory_space<vmem>>, %arg6: memref<8x128xf32, #tpu.memory_space<vmem>>) attributes {dimension_semantics = [#tpu.dimension_semantics<parallel>], iteration_bounds = array<i64: 2>, scalar_prefetch = 0 : i64, scratch_operands = 0 : i64, tpu.core_type = #tpu.core_type<tc>, window_params = [{transform_indices = @transform_0, window_bounds = array<i64: 8, 16>}, {pipeline_mode = #tpu.pipeline_mode<synchronous>, transform_indices = @transform_1, window_bounds = array<i64: 16, 128>}, {pipeline_mode = #tpu.pipeline_mode<synchronous>, transform_indices = @transform_2, window_bounds = array<i64: 1, 128>}, {pipeline_mode = #tpu.pipeline_mode<synchronous>, transform_indices = @transform_3, window_bounds = array<i64: 128, 128>}, {pipeline_mode = #tpu.pipeline_mode<synchronous>, transform_indices = @transform_4, window_bounds = array<i64: 1, 128>}, {transform_indices = @transform_5, window_bounds = array<i64: 8, 128>}]} {
    %c0 = arith.constant 0 : index
    %c0_0 = arith.constant 0 : index
    %0 = vector.load %arg1[%c0, %c0_0] : memref<8x16xbf16, #tpu.memory_space<vmem>>, vector<8x16xbf16>
    %c0_1 = arith.constant 0 : index
    %c0_2 = arith.constant 0 : index
    %1 = vector.load %arg2[%c0_1, %c0_2] : memref<16x128xbf16, #tpu.memory_space<vmem>>, vector<16x128xbf16>
    %cst = arith.constant dense<0.000000e+00> : vector<8x128xf32>
    %2 = tpu.matmul %0, %1, %cst {dimension_numbers = #tpu.dot_dimension_numbers<[1], [0], [0], [1], [0, 0, 1, 1], [], []>} : vector<8x16xbf16>, vector<16x128xbf16>, vector<8x128xf32> -> vector<8x128xf32>
    %c0_3 = arith.constant 0 : index
    %c0_4 = arith.constant 0 : index
    %3 = vector.load %arg3[%c0_3, %c0_4] : memref<1x128xf32, #tpu.memory_space<vmem>>, vector<1x128xf32>
    %4 = vector.broadcast %3 : vector<1x128xf32> to vector<8x128xf32>
    %5 = arith.addf %2, %4 : vector<8x128xf32>
    %cst_5 = arith.constant 0.000000e+00 : f32
    %6 = vector.broadcast %cst_5 : f32 to vector<8x128xf32>
    %7 = arith.maximumf %5, %6 : vector<8x128xf32>
    %8 = arith.truncf %7 : vector<8x128xf32> to vector<8x128xbf16>
    %c0_6 = arith.constant 0 : index
    %c0_7 = arith.constant 0 : index
    %9 = vector.load %arg4[%c0_6, %c0_7] : memref<128x128xbf16, #tpu.memory_space<vmem>>, vector<128x128xbf16>
    %cst_8 = arith.constant dense<0.000000e+00> : vector<8x128xf32>
    %10 = tpu.matmul %8, %9, %cst_8 {dimension_numbers = #tpu.dot_dimension_numbers<[1], [0], [0], [1], [0, 0, 1, 1], [], []>} : vector<8x128xbf16>, vector<128x128xbf16>, vector<8x128xf32> -> vector<8x128xf32>
    %c0_9 = arith.constant 0 : index
    %c0_10 = arith.constant 0 : index
    %11 = vector.load %arg5[%c0_9, %c0_10] : memref<1x128xf32, #tpu.memory_space<vmem>>, vector<1x128xf32>
    %12 = vector.broadcast %11 : vector<1x128xf32> to vector<8x128xf32>
    %13 = arith.addf %10, %12 : vector<8x128xf32>
    %c0_11 = arith.constant 0 : index
    %c0_12 = arith.constant 0 : index
    %14 = vector.load %arg6[%c0_11, %c0_12] : memref<8x128xf32, #tpu.memory_space<vmem>>, vector<8x128xf32>
    tpu.vector_store %arg6[%c0_11, %c0_12], %13 {strides = array<i32>} : memref<8x128xf32, #tpu.memory_space<vmem>>, vector<8x128xf32>,
    return
  }
  func.func @transform_0(%arg0: i32) -> (i32, i32) {
    %c0_i32 = arith.constant 0 : i32
    %c0_i32_0 = arith.constant 0 : i32
    return %arg0, %c0_i32 : i32, i32
  }
  func.func @transform_1(%arg0: i32) -> (i32, i32) {
    %c0_i32 = arith.constant 0 : i32
    %c0_i32_0 = arith.constant 0 : i32
    %c0_i32_1 = arith.constant 0 : i32
    return %c0_i32, %c0_i32_0 : i32, i32
  }
  func.func @transform_2(%arg0: i32) -> (i32, i32) {
    %c0_i32 = arith.constant 0 : i32
    %c0_i32_0 = arith.constant 0 : i32
    %c0_i32_1 = arith.constant 0 : i32
    return %c0_i32, %c0_i32_0 : i32, i32
  }
  func.func @transform_3(%arg0: i32) -> (i32, i32) {
    %c0_i32 = arith.constant 0 : i32
    %c0_i32_0 = arith.constant 0 : i32
    %c0_i32_1 = arith.constant 0 : i32
    return %c0_i32, %c0_i32_0 : i32, i32
  }
  func.func @transform_4(%arg0: i32) -> (i32, i32) {
    %c0_i32 = arith.constant 0 : i32
    %c0_i32_0 = arith.constant 0 : i32
    %c0_i32_1 = arith.constant 0 : i32
    return %c0_i32, %c0_i32_0 : i32, i32
  }
  func.func @transform_5(%arg0: i32) -> (i32, i32) {
    %c0_i32 = arith.constant 0 : i32
    %c0_i32_0 = arith.constant 0 : i32
    return %arg0, %c0_i32 : i32, i32
  }
}

</mosaic_0001>

<bundles_post_ra>
// kernel: tpu_custom_call.1
= control target key start
LH: loop header
LB: loop body
LE: loop exit
PB: predicated region body
PF: predicated region fallthrough
CT: control target
= control target key end

     0   :  { %10 = vsyncpa [#allocation3], 0  ;;  %s1064_s0 = inlined_call_operand.hbm [shape: bf16[16,16], index: 0, kind: input, shape index: {}]   ;;  %s1065_s1 = inlined_call_operand.hbm [shape: bf16[16,128], index: 1, kind: input, shape index: {}]   ;;  %s1066_s2 = inlined_call_operand.vmem [shape: f32[1,128], index: 2, kind: input, shape index: {}]   ;;  %s1067_s3 = inlined_call_operand.hbm [shape: bf16[128,128], index: 3, kind: input, shape index: {}]   ;;  %s1068_s4 = inlined_call_operand.vmem [shape: f32[1,128], index: 4, kind: input, shape index: {}]   ;;  %s1069_s5 = inlined_call_operand.hbm [shape: f32[16,128], index: 5, kind: output, shape index: {}]  }
   0x1   :  { %12 = vsyncpa [#allocation3 + $0x1], 0 }
   0x2   :  { %13 = vsyncpa [#allocation6], 0 }
   0x3   :  { %14 = vsyncpa [#allocation4], 0 }
   0x4   :  { %16 = vsyncpa [#allocation4 + $0x1], 0  ;;  %s880_s18 = smov 0   ;;  %s882_s19 = smov 0  }
   0x5   :  { %s884_s20 = smov 0   ;;  %s886_s21 = smov 0  }
   0x6 LB: > { %s901_s22 = sadd.s32 4294967295, %s840_s21   ;;  %s547_s23 = sadd.s32 4294967294, %s840_s21   ;;  %s840_s21 = sphi %s886_s21, %s1091_s21   ;;  %s836_s20 = sphi %s884_s20, %s1090_s20   ;;  %s832_s19 = sphi %s882_s19, %s1089_s19   ;;  %s828_s18 = sphi %s880_s18, %s1088_s18  }
   0x7   : > { %p42_p0 = scmp.ne.s32.totalorder %s832_s19, %s828_s18  ;;  %p1070_p1 = scmp.eq.s32.totalorder %s901_s22, 0 }
   0x8   : > { %p156_p3 = scmp.eq.s32.totalorder %s547_s23, 1  ;;  %p548_p5 = scmp.ge.s32.totalorder %s840_s21, 1 }
   0x9   : > { %p910_p4 = por %p1070_p1, %p42_p0  ;;  %p163_p7 = scmp.lt.s32.totalorder %s840_s21, 3 }
   0xa   : > { %p915_p6 = por %p156_p3, %p42_p0  ;;  %s842_s27 = smov [#allocation5]  }
   0xb   : > { %s1074_s24 = scalar_select %p910_p4, 1, 0 }
   0xc   : > { %s1075_s25 = scalar_select %p915_p6, 1, 0 }
   0xd   : > { %p920_p8 = pnand %p548_p5, %p163_p7  ;;  %s175_s28 = sshll.u32 %s842_s27, 4  ;;  %s176_s28 = int_to_ptr.vmem [resolvable:$true] %s175_s28 }
   0xe   : > { %s843_s30 = smov [#allocation7]   ;;  %s703_s7 = scalar_lea.vmem %s176_s28, 128 }
   0xf   : > { %s1076_s26 = scalar_select %p920_p8, 1, 0 }
  0x10   : > { %p624_p9 = pneg %p920_p8  ;;  %s191_s6 = sshll.u32 %s843_s30, 4  ;;  %s192_s6 = int_to_ptr.vmem [resolvable:$true] %s191_s6 }
  0x11   : > { %p704_p13 = scmp.ne.s32.totalorder %s176_s28, %s703_s7  ;;  %p711_p5 = scmp.lt.s32.totalorder %s176_s28, %s176_s28 }
  0x12   : > { %p929_p11 = pnand %p624_p9, %p1070_p1  ;;  %p712_p7 = scmp.lt.s32.totalorder %s703_s7, %s703_s7 }
  0x14   : > { %p694_p12 = pneg %p929_p11  ;;  %p713_p10 = por %p712_p7, %p711_p5 }
  0x16   : > { %p706_p0 = pnand %p704_p13, %p694_p12 }
  0x18   : > { %p707_p3 = pneg %p706_p0 }
  0x1a   : > { %p714_p9 = pnand %p713_p10, %p707_p3 }
  0x1c   : > { %717 = shalt.err (!%p714_p9)
}
  0x1d   : > { %s844_s8 = smov 64   ;;  %s845_s9 = smov 4  }
  0x1e   : > { %627 = dma.hbm_to_vmem [thread:$0]  (!%p929_p11), %s1065_s1, 128, %s176_s28, [#allocation6], %s844_s8, %s844_s8, %s845_s9  }
  0x1f   : > { %s729_s12 = scalar_lea.vmem %s192_s6, 1024  ;;  %p737_p2 = scmp.lt.s32.totalorder %s192_s6, %s192_s6 }
  0x20   : > { %p730_p1 = scmp.ne.s32.totalorder %s192_s6, %s729_s12  ;;  %p738_p6 = scmp.lt.s32.totalorder %s729_s12, %s729_s12 }
  0x22   : > { %p732_p13 = pnand %p730_p1, %p694_p12  ;;  %p739_p5 = por %p738_p6, %p737_p2 }
  0x24   : > { %p733_p0 = pneg %p732_p13 }
  0x26   : > { %p740_p10 = pnand %p739_p5, %p733_p0 }
  0x28   : > { %743 = shalt.err (!%p740_p10)
}
  0x29   : > { %630 = dma.hbm_to_vmem [thread:$0]  (!%p929_p11), %s1067_s3, 1024, %s192_s6, [#allocation6], %s844_s8, %s844_s8, %s845_s9  }
  0x2a   : > { %s952_s15 = sadd.s32 1, %s840_s21   ;;  %s29_s16 = sadd.s32 1, %s836_s20 }
  0x2b   : > { %s26_s17 = ssub.s32 %s840_s21, %s952_s15  ;;  %p36_p1 = scmp.ne.s32.totalorder %s836_s20, %s832_s19 }
  0x2c   : > { %p27_p2 = scmp.eq.s32.totalorder %s26_s17, 0  ;;  %p37_p6 = scmp.eq.s32.totalorder %s840_s21, 0 }
  0x2d   : > { %p1078_p12 = scmp.eq.s32.totalorder %s901_s22, 1  ;;  %p641_p7 = scmp.lt.s32.totalorder %s840_s21, 2 }
  0x2e   : > { %s968_s27 = scalar_select %p27_p2, %s836_s20, %s29_s16  }
  0x2f   : > { %p962_p3 = por %p1078_p12, %p36_p1  ;;  %p38_p9 = por %p37_p6, %p36_p1 }
  0x30   : > { %s208_s28 = sand.u32 1, %s836_s20   ;;  %s553_s30 = sshll.u32 %s840_s21, 6 }
  0x31   : > { %s1079_s23 = scalar_select %p962_p3, 1, 0 }
  0x32   : > { %s552_s29 = sshll.u32 %s208_s28, 2  ;;  %s975_s8 = scalar_lea.hbm %s1064_s0, %s553_s30 }
  0x33   : > { %s212_s9 = scalar_lea.vmem [#allocation2], %s552_s29  ;;  %p977_p11 = pnand %p641_p7, %p38_p9 }
  0x34   : > { %s219_s10 = sshll.u32 %s212_s9, 4  ;;  %s209_s12 = scalar_lea.sflag [#allocation3], %s208_s28  ;;  %s220_s10 = int_to_ptr.vmem [resolvable:$true] %s219_s10 }
  0x35   : > { %s744_s13 = scalar_lea.hbm %s975_s8, 64  ;;  %p746_p0 = pneg %p977_p11 }
  0x36   : > { %p745_p13 = scmp.ne.s32.totalorder %s975_s8, %s744_s13  ;;  %s749_s17 = scalar_lea.hbm %s1064_s0, 128 }
  0x37   : > { %p750_p1 = scmp.lt.s32.totalorder %s975_s8, %s1064_s0  ;;  %p751_p2 = scmp.lt.s32.totalorder %s749_s17, %s744_s13 }
  0x38   : > { %p747_p5 = pnand %p746_p0, %p745_p13 }
  0x39   : > { %p752_p6 = por %p751_p2, %p750_p1 }
  0x3a   : > { %p748_p10 = pneg %p747_p5 }
  0x3c   : > { %p753_p12 = pnand %p752_p6, %p748_p10 }
  0x3e   : > { %756 = shalt.err (!%p753_p12)
}
  0x3f   : > { %s757_s6 = scalar_lea.vmem %s220_s10, 64  ;;  %s846_s28 = smov [#allocation2]  }
  0x40   : > { %p758_p7 = scmp.ne.s32.totalorder %s220_s10, %s757_s6  ;;  %s762_s7 = sshll.u32 %s846_s28, 4  ;;  %s763_s7 = int_to_ptr.vmem [resolvable:$false] %s762_s7 }
  0x41   : > { %s764_s9 = scalar_lea.vmem %s763_s7, 128  ;;  %p765_p13 = scmp.lt.s32.totalorder %s220_s10, %s763_s7 }
  0x42   : > { %p760_p9 = pnand %p758_p7, %p746_p0  ;;  %p766_p5 = scmp.lt.s32.totalorder %s764_s9, %s757_s6 }
  0x44   : > { %p761_p3 = pneg %p760_p9  ;;  %p767_p4 = por %p766_p5, %p765_p13 }
  0x46   : > { %p768_p8 = pnand %p767_p4, %p761_p3 }
  0x48   : > { %771 = shalt.err (!%p768_p8)
}
  0x49   : > { %634 = dma.hbm_to_vmem [thread:$0]  (!%p977_p11), %s975_s8, 64, %s220_s10, %s209_s12  }
  0x4a   : > { %p1081_p10 = scmp.ne.s32.totalorder %s1076_s26, 0 }
  0x4b   : > { %s998_s13 = sand.u32 (!%p1081_p10), 1, %s832_s19   ;;  %p1082_p0 = scmp.ne.s32.totalorder (!%p1081_p10), %s1074_s24, 0 }
  0x4c   : > { %228 = sbr.rel (%p1081_p10) target bundleno = 499 (0x1f3), region = 40  ;;  %s555_s14 = sshll.u32 (!%p1081_p10), %s998_s13, 2 }
  0x4d   : > { %s231_s16 = scalar_lea.sflag (!%p1081_p10), [#allocation3], %s998_s13  ;;  %s234_s17 = scalar_lea.vmem (!%p1081_p10), [#allocation2], %s555_s14 }
  0x51   : > { %815 = dma.done.wait (%p1082_p0), %s231_s16, 64  }
  0x52   : > { %817 = vsyncadd (%p1082_p0), %s231_s16, 4294967232  ;;  %p1083_p4 = scmp.eq.s32.totalorder %s901_s22, 0 }
  0x54   : > { %819 = dma.done.wait (%p1083_p4), [#allocation6], 1152   ;;  %p1084_p8 = pmov %p1083_p4 }
  0x55   : > { %v847_v0 = vmov 0.0   ;;  %vm848_vm0 = vmmov 0   ;;  %v683_v1 = vld [vmem:[#allocation5] sm:$0xff]   ;;  %v270_v2 = vld [vmem:[%s234_s17] sm:$0xf]  ;;  %vm286_vm1 = vcmask 130048  }
  0x56   : > { %821 = vsyncadd (%p1084_p8), [#allocation6], 4294966144  ;;  %586 = vmatprep.subr.bf16.mxu0 %v847_v0  ;;  %588 = vmatprep.mubr.msk.bf16.mxu0 %vm848_vm0, %v847_v0  ;;  %v684_v3 = vld [vmem:[#allocation7 + $0x38] sm:$0xff]   ;;  %v685_v4 = vld [vmem:[#allocation7 + $0x30] sm:$0xff]   ;;  %s558_s8 = sshll.u32 %s998_s13, 3  ;;  %s572_s12 = sshll.u32 %s901_s22, 7 }
  0x57   : > { %592 = vmatprep.subr.bf16.mxu1 %v847_v0  ;;  %608 = vmatprep.mubr.msk.bf16.mxu1 %vm848_vm0, %v847_v0  ;;  %v686_v5 = vld [vmem:[#allocation7 + $0x28] sm:$0xff]   ;;  %v687_v6 = vld [vmem:[#allocation7 + $0x20] sm:$0xff]   ;;  %v688_v7 = vld [vmem:[#allocation7 + $0x18] sm:$0xff]   ;;  %s268_s30 = scalar_lea.vmem [#allocation8], %s558_s8  ;;  %s1021_s7 = scalar_lea.hbm %s1069_s5, %s572_s12 }
  0x58   : > { %587 = vmatpush3.bf16.msra.mxu0 %v683_v1  ;;  %593 = vmatpush3.bf16.msra.mxu1 %v684_v3  ;;  %v689_v8 = vld [vmem:[#allocation7 + $0x10] sm:$0xff]   ;;  %v690_v9 = vld [vmem:[#allocation7 + $0x8] sm:$0xff]   ;;  %v691_v10 = vld [vmem:[#allocation7] sm:$0xff]   ;;  %s458_s29 = sshll.u32 %s268_s30, 4  ;;  %s445_s9 = scalar_lea.sflag [#allocation4], %s998_s13  ;;  %s1023_s29 = int_to_ptr.vmem [resolvable:$true] %s458_s29 }
  0x59   : > { %594 = vmatprep.subr.bf16.mxu1 %v847_v0  ;;  %v559_v11 = vld [vmem:[%s1066_s2] ss:$0 sm:$0xff]  ;;  %s772_s14 = scalar_lea.vmem %s1023_s29, 128  ;;  %p1085_p11 = scmp.ne.s32.totalorder %s1079_s23, 0 }
  0x5a   : > { %v562_v19 = vld [vmem:[%s1068_s4] ss:$0 sm:$0xff]  ;;  %p773_p3 = scmp.ne.s32.totalorder %s1023_s29, %s772_s14  ;;  %s849_s22 = smov [#allocation8]  }
  0x5b   : > { %589 = vmatmul.mubr.msk.bf16.vlgmr.msra.gmra.mxu0 %vm286_vm1, %v270_v2  ;;  %s776_s16 = sshll.u32 %s849_s22, 4  ;;  %s777_s16 = int_to_ptr.vmem [resolvable:$false] %s776_s16 }
  0x5c   : > { %595 = vmatpush3.bf16.msra.mxu1 %v685_v4  ;;  %p774_p1 = pnand %p773_p3, %p1085_p11  ;;  %s778_s17 = scalar_lea.vmem %s777_s16, 256 }
  0x5d   : > { %596 = vmatprep.subr.bf16.mxu1 %v847_v0  ;;  %p779_p6 = scmp.lt.s32.totalorder %s1023_s29, %s777_s16  ;;  %p780_p12 = scmp.lt.s32.totalorder %s778_s17, %s772_s14 }
  0x5e   : > { %p775_p2 = pneg %p774_p1 }
  0x5f   : > { %p781_p7 = por %p780_p12, %p779_p6 }
  0x60   : > { %597 = vmatpush3.bf16.msra.mxu1 %v686_v5 }
  0x61   : > { %598 = vmatprep.subr.bf16.mxu1 %v847_v0  ;;  %p782_p9 = pnand %p781_p7, %p775_p2 }
  0x64   : > { %599 = vmatpush3.bf16.msra.mxu1 %v687_v6 }
  0x65   : > { %600 = vmatprep.subr.bf16.mxu1 %v847_v0 }
  0x68   : > { %601 = vmatpush3.bf16.msra.mxu1 %v688_v7 }
  0x69   : > { %602 = vmatprep.subr.bf16.mxu1 %v847_v0 }
  0x6c   : > { %603 = vmatpush3.bf16.msra.mxu1 %v689_v8 }
  0x6d   : > { %604 = vmatprep.subr.bf16.mxu1 %v847_v0 }
  0x70   : > { %605 = vmatpush3.bf16.msra.mxu1 %v690_v9 }
  0x71   : > { %606 = vmatprep.subr.bf16.mxu1 %v847_v0 }
  0x74   : > { %607 = vmatpush3.bf16.msra.mxu1 %v691_v10 }
 0x11b   : > { %v324_v12 = vpop.f32.mrf.mxu0 }
 0x11c   : > { %v325_v13 = vadd.f32 %v559_v11, %v324_v12 }
 0x11d   : > { %v590_v14 = vpop.f32.mrf.mxu0 }
 0x11e   : > { %v330_v15 = vmax.f32 %v325_v13, 0.0 }
 0x11f   : > { %v327_v16 = vpop.f32.mrf.mxu0 }
 0x120   : > { %v331_v17 = vpack.c.bf16 %v330_v15, %v330_v15 }
 0x121   : > { %v591_v18 = vpop.f32.mrf.mxu0 }
 0x122   : > { %609 = vmatmul.mubr.bf16.vlgmr.msra.gmra.mxu1 %v331_v17 }
 0x1e2   : > { %v437_v20 = vpop.f32.mrf.mxu1 }
 0x1e3   : > { %v438_v21 = vadd.f32 %v562_v19, %v437_v20 }
 0x1e4   : > { %v610_v22 = vpop.f32.mrf.mxu1 }
 0x1e5   : > { %443 = vst [vmem:[%s268_s30] sm:$0xff] %v438_v21 }
 0x1e6   : > { %v440_v23 = vpop.f32.mrf.mxu1 }
 0x1e7   : > { %785 = shalt.err (!%p782_p9)
}
 0x1e8   : > { %s786_s24 = scalar_lea.hbm %s1021_s7, 128  ;;  %s790_s8 = scalar_lea.hbm %s1069_s5, 256 }
 0x1e9   : > { %p787_p13 = scmp.ne.s32.totalorder %s1021_s7, %s786_s24  ;;  %p791_p0 = scmp.lt.s32.totalorder %s1021_s7, %s1069_s5 }
 0x1ea   : > { %p792_p4 = scmp.lt.s32.totalorder %s790_s8, %s786_s24 }
 0x1eb   : > { %p788_p5 = pnand %p787_p13, %p1085_p11 }
 0x1ec   : > { %p793_p8 = por %p792_p4, %p791_p0 }
 0x1ed   : > { %p789_p10 = pneg %p788_p5 }
 0x1ef   : > { %p794_p3 = pnand %p793_p8, %p789_p10 }
 0x1f1   : > { %797 = shalt.err (!%p794_p3)
}
 0x1f2   : > { %622 = dma.vmem_to_hbm [thread:$0]  (%p1085_p11), %s1023_s29, 128, %s1021_s7, %s445_s9   ;;  %v611_v24 = vpop.f32.mrf.mxu1 }
 0x1f3 PF: > { %s470_s12 = sand.u32 1, %s828_s18   ;;  %p1086_p1 = scmp.ne.s32.totalorder %s1075_s25, 0 }
 0x1f4   : > { %p1087_p2 = scmp.ge.s32.totalorder %s840_s21, 2  ;;  %s471_s30 = scalar_lea.sflag [#allocation4], %s470_s12 }
 0x1f6   : > { %p636_p6 = pnand %p1087_p2, %p1086_p1 }
 0x1f8   : > { %p637_p12 = pneg %p636_p6 }
 0x1fa   : > { %823 = dma.done.wait (%p637_p12), %s471_s30, 128  }
 0x1fb   : > { %825 = vsyncadd (%p637_p12), %s471_s30, 4294967168  ;;  %p19_p7 = scmp.ge.s32.totalorder %s952_s15, 4   ;;  %s1088_s18 = smov %s832_s19 }
 0x1fc   : > { %s1089_s19 = smov %s836_s20  ;;  %s1090_s20 = smov %s968_s27 }
 0x1fd   : > { %s1091_s21 = smov %s952_s15  ;;  %21 = sbr.rel (!%p19_p7) target bundleno = 6 (0x6), region = 93 }
 0x202   :  { %476 = vsyncpa [#allocation3], 1 }
 0x203   :  { %478 = vsyncpa [#allocation3 + $0x1], 1 }
 0x204   :  { %479 = vsyncpa [#allocation6], 1 }
 0x205   :  { %480 = vsyncpa [#allocation4], 1 }
 0x206   :  { %482 = vsyncpa [#allocation4 + $0x1], 1 }

// kernel: tpu_custom_call.1
= control target key start
LH: loop header
LB: loop body
LE: loop exit
PB: predicated region body
PF: predicated region fallthrough
CT: control target
= control target key end

     0   :  { %10 = vsyncpa [#allocation3], 0  ;;  %s1064_s0 = inlined_call_operand.hbm [shape: bf16[16,16], index: 0, kind: input, shape index: {}]   ;;  %s1065_s1 = inlined_call_operand.hbm [shape: bf16[16,128], index: 1, kind: input, shape index: {}]   ;;  %s1066_s2 = inlined_call_operand.vmem [shape: f32[1,128], index: 2, kind: input, shape index: {}]   ;;  %s1067_s3 = inlined_call_operand.hbm [shape: bf16[128,128], index: 3, kind: input, shape index: {}]   ;;  %s1068_s4 = inlined_call_operand.vmem [shape: f32[1,128], index: 4, kind: input, shape index: {}]   ;;  %s1069_s5 = inlined_call_operand.hbm [shape: f32[16,128], index: 5, kind: output, shape index: {}]  }
   0x1   :  { %12 = vsyncpa [#allocation3 + $0x1], 0 }
   0x2   :  { %13 = vsyncpa [#allocation6], 0 }
   0x3   :  { %14 = vsyncpa [#allocation4], 0 }
   0x4   :  { %16 = vsyncpa [#allocation4 + $0x1], 0  ;;  %s880_s18 = smov 0   ;;  %s882_s19 = smov 0  }
   0x5   :  { %s884_s20 = smov 0   ;;  %s886_s21 = smov 0  }
   0x6 LB: > { %s901_s22 = sadd.s32 4294967295, %s840_s21   ;;  %s547_s23 = sadd.s32 4294967294, %s840_s21   ;;  %s840_s21 = sphi %s886_s21, %s1091_s21   ;;  %s836_s20 = sphi %s884_s20, %s1090_s20   ;;  %s832_s19 = sphi %s882_s19, %s1089_s19   ;;  %s828_s18 = sphi %s880_s18, %s1088_s18  }
   0x7   : > { %p42_p0 = scmp.ne.s32.totalorder %s832_s19, %s828_s18  ;;  %p1070_p1 = scmp.eq.s32.totalorder %s901_s22, 0 }
   0x8   : > { %p156_p3 = scmp.eq.s32.totalorder %s547_s23, 1  ;;  %p548_p5 = scmp.ge.s32.totalorder %s840_s21, 1 }
   0x9   : > { %p910_p4 = por %p1070_p1, %p42_p0  ;;  %p163_p7 = scmp.lt.s32.totalorder %s840_s21, 3 }
   0xa   : > { %p915_p6 = por %p156_p3, %p42_p0  ;;  %s842_s27 = smov [#allocation5]  }
   0xb   : > { %s1074_s24 = scalar_select %p910_p4, 1, 0 }
   0xc   : > { %s1075_s25 = scalar_select %p915_p6, 1, 0 }
   0xd   : > { %p920_p8 = pnand %p548_p5, %p163_p7  ;;  %s175_s28 = sshll.u32 %s842_s27, 4  ;;  %s176_s28 = int_to_ptr.vmem [resolvable:$true] %s175_s28 }
   0xe   : > { %s843_s30 = smov [#allocation7]   ;;  %s703_s7 = scalar_lea.vmem %s176_s28, 128 }
   0xf   : > { %s1076_s26 = scalar_select %p920_p8, 1, 0 }
  0x10   : > { %p624_p9 = pneg %p920_p8  ;;  %s191_s6 = sshll.u32 %s843_s30, 4  ;;  %s192_s6 = int_to_ptr.vmem [resolvable:$true] %s191_s6 }
  0x11   : > { %p704_p13 = scmp.ne.s32.totalorder %s176_s28, %s703_s7  ;;  %p711_p5 = scmp.lt.s32.totalorder %s176_s28, %s176_s28 }
  0x12   : > { %p929_p11 = pnand %p624_p9, %p1070_p1  ;;  %p712_p7 = scmp.lt.s32.totalorder %s703_s7, %s703_s7 }
  0x14   : > { %p694_p12 = pneg %p929_p11  ;;  %p713_p10 = por %p712_p7, %p711_p5 }
  0x16   : > { %p706_p0 = pnand %p704_p13, %p694_p12 }
  0x18   : > { %p707_p3 = pneg %p706_p0 }
  0x1a   : > { %p714_p9 = pnand %p713_p10, %p707_p3 }
  0x1c   : > { %717 = shalt.err (!%p714_p9)
}
  0x1d   : > { %s844_s8 = smov 64   ;;  %s845_s9 = smov 4  }
  0x1e   : > { %627 = dma.hbm_to_vmem [thread:$0]  (!%p929_p11), %s1065_s1, 128, %s176_s28, [#allocation6], %s844_s8, %s844_s8, %s845_s9  }
  0x1f   : > { %s729_s12 = scalar_lea.vmem %s192_s6, 1024  ;;  %p737_p2 = scmp.lt.s32.totalorder %s192_s6, %s192_s6 }
  0x20   : > { %p730_p1 = scmp.ne.s32.totalorder %s192_s6, %s729_s12  ;;  %p738_p6 = scmp.lt.s32.totalorder %s729_s12, %s729_s12 }
  0x22   : > { %p732_p13 = pnand %p730_p1, %p694_p12  ;;  %p739_p5 = por %p738_p6, %p737_p2 }
  0x24   : > { %p733_p0 = pneg %p732_p13 }
  0x26   : > { %p740_p10 = pnand %p739_p5, %p733_p0 }
  0x28   : > { %743 = shalt.err (!%p740_p10)
}
  0x29   : > { %630 = dma.hbm_to_vmem [thread:$0]  (!%p929_p11), %s1067_s3, 1024, %s192_s6, [#allocation6], %s844_s8, %s844_s8, %s845_s9  }
  0x2a   : > { %s952_s15 = sadd.s32 1, %s840_s21   ;;  %s29_s16 = sadd.s32 1, %s836_s20 }
  0x2b   : > { %s26_s17 = ssub.s32 %s840_s21, %s952_s15  ;;  %p36_p1 = scmp.ne.s32.totalorder %s836_s20, %s832_s19 }
  0x2c   : > { %p27_p2 = scmp.eq.s32.totalorder %s26_s17, 0  ;;  %p37_p6 = scmp.eq.s32.totalorder %s840_s21, 0 }
  0x2d   : > { %p1078_p12 = scmp.eq.s32.totalorder %s901_s22, 1  ;;  %p641_p7 = scmp.lt.s32.totalorder %s840_s21, 2 }
  0x2e   : > { %s968_s27 = scalar_select %p27_p2, %s836_s20, %s29_s16  }
  0x2f   : > { %p962_p3 = por %p1078_p12, %p36_p1  ;;  %p38_p9 = por %p37_p6, %p36_p1 }
  0x30   : > { %s208_s28 = sand.u32 1, %s836_s20   ;;  %s553_s30 = sshll.u32 %s840_s21, 6 }
  0x31   : > { %s1079_s23 = scalar_select %p962_p3, 1, 0 }
  0x32   : > { %s552_s29 = sshll.u32 %s208_s28, 2  ;;  %s975_s8 = scalar_lea.hbm %s1064_s0, %s553_s30 }
  0x33   : > { %s212_s9 = scalar_lea.vmem [#allocation2], %s552_s29  ;;  %p977_p11 = pnand %p641_p7, %p38_p9 }
  0x34   : > { %s219_s10 = sshll.u32 %s212_s9, 4  ;;  %s209_s12 = scalar_lea.sflag [#allocation3], %s208_s28  ;;  %s220_s10 = int_to_ptr.vmem [resolvable:$true] %s219_s10 }
  0x35   : > { %s744_s13 = scalar_lea.hbm %s975_s8, 64  ;;  %p746_p0 = pneg %p977_p11 }
  0x36   : > { %p745_p13 = scmp.ne.s32.totalorder %s975_s8, %s744_s13  ;;  %s749_s17 = scalar_lea.hbm %s1064_s0, 128 }
  0x37   : > { %p750_p1 = scmp.lt.s32.totalorder %s975_s8, %s1064_s0  ;;  %p751_p2 = scmp.lt.s32.totalorder %s749_s17, %s744_s13 }
  0x38   : > { %p747_p5 = pnand %p746_p0, %p745_p13 }
  0x39   : > { %p752_p6 = por %p751_p2, %p750_p1 }
  0x3a   : > { %p748_p10 = pneg %p747_p5 }
  0x3c   : > { %p753_p12 = pnand %p752_p6, %p748_p10 }
  0x3e   : > { %756 = shalt.err (!%p753_p12)
}
  0x3f   : > { %s757_s6 = scalar_lea.vmem %s220_s10, 64  ;;  %s846_s28 = smov [#allocation2]  }
  0x40   : > { %p758_p7 = scmp.ne.s32.totalorder %s220_s10, %s757_s6  ;;  %s762_s7 = sshll.u32 %s846_s28, 4  ;;  %s763_s7 = int_to_ptr.vmem [resolvable:$false] %s762_s7 }
  0x41   : > { %s764_s9 = scalar_lea.vmem %s763_s7, 128  ;;  %p765_p13 = scmp.lt.s32.totalorder %s220_s10, %s763_s7 }
  0x42   : > { %p760_p9 = pnand %p758_p7, %p746_p0  ;;  %p766_p5 = scmp.lt.s32.totalorder %s764_s9, %s757_s6 }
  0x44   : > { %p761_p3 = pneg %p760_p9  ;;  %p767_p4 = por %p766_p5, %p765_p13 }
  0x46   : > { %p768_p8 = pnand %p767_p4, %p761_p3 }
  0x48   : > { %771 = shalt.err (!%p768_p8)
}
  0x49   : > { %634 = dma.hbm_to_vmem [thread:$0]  (!%p977_p11), %s975_s8, 64, %s220_s10, %s209_s12  }
  0x4a   : > { %p1081_p10 = scmp.ne.s32.totalorder %s1076_s26, 0 }
  0x4b   : > { %s998_s13 = sand.u32 (!%p1081_p10), 1, %s832_s19   ;;  %p1082_p0 = scmp.ne.s32.totalorder (!%p1081_p10), %s1074_s24, 0 }
  0x4c   : > { %228 = sbr.rel (%p1081_p10) target bundleno = 499 (0x1f3), region = 40  ;;  %s555_s14 = sshll.u32 (!%p1081_p10), %s998_s13, 2 }
  0x4d   : > { %s231_s16 = scalar_lea.sflag (!%p1081_p10), [#allocation3], %s998_s13  ;;  %s234_s17 = scalar_lea.vmem (!%p1081_p10), [#allocation2], %s555_s14 }
  0x51   : > { %815 = dma.done.wait (%p1082_p0), %s231_s16, 64  }
  0x52   : > { %817 = vsyncadd (%p1082_p0), %s231_s16, 4294967232  ;;  %p1083_p4 = scmp.eq.s32.totalorder %s901_s22, 0 }
  0x54   : > { %819 = dma.done.wait (%p1083_p4), [#allocation6], 1152   ;;  %p1084_p8 = pmov %p1083_p4 }
  0x55   : > { %v847_v0 = vmov 0.0   ;;  %vm848_vm0 = vmmov 0   ;;  %v683_v1 = vld [vmem:[#allocation5] sm:$0xff]   ;;  %v270_v2 = vld [vmem:[%s234_s17] sm:$0xf]  ;;  %vm286_vm1 = vcmask 130048  }
  0x56   : > { %821 = vsyncadd (%p1084_p8), [#allocation6], 4294966144  ;;  %586 = vmatprep.subr.bf16.mxu0 %v847_v0  ;;  %588 = vmatprep.mubr.msk.bf16.mxu0 %vm848_vm0, %v847_v0  ;;  %v684_v3 = vld [vmem:[#allocation7 + $0x38] sm:$0xff]   ;;  %v685_v4 = vld [vmem:[#allocation7 + $0x30] sm:$0xff]   ;;  %s558_s8 = sshll.u32 %s998_s13, 3  ;;  %s572_s12 = sshll.u32 %s901_s22, 7 }
  0x57   : > { %592 = vmatprep.subr.bf16.mxu1 %v847_v0  ;;  %608 = vmatprep.mubr.msk.bf16.mxu1 %vm848_vm0, %v847_v0  ;;  %v686_v5 = vld [vmem:[#allocation7 + $0x28] sm:$0xff]   ;;  %v687_v6 = vld [vmem:[#allocation7 + $0x20] sm:$0xff]   ;;  %v688_v7 = vld [vmem:[#allocation7 + $0x18] sm:$0xff]   ;;  %s268_s30 = scalar_lea.vmem [#allocation8], %s558_s8  ;;  %s1021_s7 = scalar_lea.hbm %s1069_s5, %s572_s12 }
  0x58   : > { %587 = vmatpush3.bf16.msra.mxu0 %v683_v1  ;;  %593 = vmatpush3.bf16.msra.mxu1 %v684_v3  ;;  %v689_v8 = vld [vmem:[#allocation7 + $0x10] sm:$0xff]   ;;  %v690_v9 = vld [vmem:[#allocation7 + $0x8] sm:$0xff]   ;;  %v691_v10 = vld [vmem:[#allocation7] sm:$0xff]   ;;  %s458_s29 = sshll.u32 %s268_s30, 4  ;;  %s445_s9 = scalar_lea.sflag [#allocation4], %s998_s13  ;;  %s1023_s29 = int_to_ptr.vmem [resolvable:$true] %s458_s29 }
  0x59   : > { %594 = vmatprep.subr.bf16.mxu1 %v847_v0  ;;  %v559_v11 = vld [vmem:[%s1066_s2] ss:$0 sm:$0xff]  ;;  %s772_s14 = scalar_lea.vmem %s1023_s29, 128  ;;  %p1085_p11 = scmp.ne.s32.totalorder %s1079_s23, 0 }
  0x5a   : > { %v562_v19 = vld [vmem:[%s1068_s4] ss:$0 sm:$0xff]  ;;  %p773_p3 = scmp.ne.s32.totalorder %s1023_s29, %s772_s14  ;;  %s849_s22 = smov [#allocation8]  }
  0x5b   : > { %589 = vmatmul.mubr.msk.bf16.vlgmr.msra.gmra.mxu0 %vm286_vm1, %v270_v2  ;;  %s776_s16 = sshll.u32 %s849_s22, 4  ;;  %s777_s16 = int_to_ptr.vmem [resolvable:$false] %s776_s16 }
  0x5c   : > { %595 = vmatpush3.bf16.msra.mxu1 %v685_v4  ;;  %p774_p1 = pnand %p773_p3, %p1085_p11  ;;  %s778_s17 = scalar_lea.vmem %s777_s16, 256 }
  0x5d   : > { %596 = vmatprep.subr.bf16.mxu1 %v847_v0  ;;  %p779_p6 = scmp.lt.s32.totalorder %s1023_s29, %s777_s16  ;;  %p780_p12 = scmp.lt.s32.totalorder %s778_s17, %s772_s14 }
  0x5e   : > { %p775_p2 = pneg %p774_p1 }
  0x5f   : > { %p781_p7 = por %p780_p12, %p779_p6 }
  0x60   : > { %597 = vmatpush3.bf16.msra.mxu1 %v686_v5 }
  0x61   : > { %598 = vmatprep.subr.bf16.mxu1 %v847_v0  ;;  %p782_p9 = pnand %p781_p7, %p775_p2 }
  0x64   : > { %599 = vmatpush3.bf16.msra.mxu1 %v687_v6 }
  0x65   : > { %600 = vmatprep.subr.bf16.mxu1 %v847_v0 }
  0x68   : > { %601 = vmatpush3.bf16.msra.mxu1 %v688_v7 }
  0x69   : > { %602 = vmatprep.subr.bf16.mxu1 %v847_v0 }
  0x6c   : > { %603 = vmatpush3.bf16.msra.mxu1 %v689_v8 }
  0x6d   : > { %604 = vmatprep.subr.bf16.mxu1 %v847_v0 }
  0x70   : > { %605 = vmatpush3.bf16.msra.mxu1 %v690_v9 }
  0x71   : > { %606 = vmatprep.subr.bf16.mxu1 %v847_v0 }
  0x74   : > { %607 = vmatpush3.bf16.msra.mxu1 %v691_v10 }
 0x11b   : > { %v324_v12 = vpop.f32.mrf.mxu0 }
 0x11c   : > { %v325_v13 = vadd.f32 %v559_v11, %v324_v12 }
 0x11d   : > { %v590_v14 = vpop.f32.mrf.mxu0 }
 0x11e   : > { %v330_v15 = vmax.f32 %v325_v13, 0.0 }
 0x11f   : > { %v327_v16 = vpop.f32.mrf.mxu0 }
 0x120   : > { %v331_v17 = vpack.c.bf16 %v330_v15, %v330_v15 }
 0x121   : > { %v591_v18 = vpop.f32.mrf.mxu0 }
 0x122   : > { %609 = vmatmul.mubr.bf16.vlgmr.msra.gmra.mxu1 %v331_v17 }
 0x1e2   : > { %v437_v20 = vpop.f32.mrf.mxu1 }
 0x1e3   : > { %v438_v21 = vadd.f32 %v562_v19, %v437_v20 }
 0x1e4   : > { %v610_v22 = vpop.f32.mrf.mxu1 }
 0x1e5   : > { %443 = vst [vmem:[%s268_s30] sm:$0xff] %v438_v21 }
 0x1e6   : > { %v440_v23 = vpop.f32.mrf.mxu1 }
 0x1e7   : > { %785 = shalt.err (!%p782_p9)
}
 0x1e8   : > { %s786_s24 = scalar_lea.hbm %s1021_s7, 128  ;;  %s790_s8 = scalar_lea.hbm %s1069_s5, 256 }
 0x1e9   : > { %p787_p13 = scmp.ne.s32.totalorder %s1021_s7, %s786_s24  ;;  %p791_p0 = scmp.lt.s32.totalorder %s1021_s7, %s1069_s5 }
 0x1ea   : > { %p792_p4 = scmp.lt.s32.totalorder %s790_s8, %s786_s24 }
 0x1eb   : > { %p788_p5 = pnand %p787_p13, %p1085_p11 }
 0x1ec   : > { %p793_p8 = por %p792_p4, %p791_p0 }
 0x1ed   : > { %p789_p10 = pneg %p788_p5 }
 0x1ef   : > { %p794_p3 = pnand %p793_p8, %p789_p10 }
 0x1f1   : > { %797 = shalt.err (!%p794_p3)
}
 0x1f2   : > { %622 = dma.vmem_to_hbm [thread:$0]  (%p1085_p11), %s1023_s29, 128, %s1021_s7, %s445_s9   ;;  %v611_v24 = vpop.f32.mrf.mxu1 }
 0x1f3 PF: > { %s470_s12 = sand.u32 1, %s828_s18   ;;  %p1086_p1 = scmp.ne.s32.totalorder %s1075_s25, 0 }
 0x1f4   : > { %p1087_p2 = scmp.ge.s32.totalorder %s840_s21, 2  ;;  %s471_s30 = scalar_lea.sflag [#allocation4], %s470_s12 }
 0x1f6   : > { %p636_p6 = pnand %p1087_p2, %p1086_p1 }
 0x1f8   : > { %p637_p12 = pneg %p636_p6 }
 0x1fa   : > { %823 = dma.done.wait (%p637_p12), %s471_s30, 128  }
 0x1fb   : > { %825 = vsyncadd (%p637_p12), %s471_s30, 4294967168  ;;  %p19_p7 = scmp.ge.s32.totalorder %s952_s15, 4   ;;  %s1088_s18 = smov %s832_s19 }
 0x1fc   : > { %s1089_s19 = smov %s836_s20  ;;  %s1090_s20 = smov %s968_s27 }
 0x1fd   : > { %s1091_s21 = smov %s952_s15  ;;  %21 = sbr.rel (!%p19_p7) target bundleno = 6 (0x6), region = 93 }
 0x202   :  { %476 = vsyncpa [#allocation3], 1 }
 0x203   :  { %478 = vsyncpa [#allocation3 + $0x1], 1 }
 0x204   :  { %479 = vsyncpa [#allocation6], 1 }
 0x205   :  { %480 = vsyncpa [#allocation4], 1 }
 0x206   :  { %482 = vsyncpa [#allocation4 + $0x1], 1 }

</bundles_post_ra>
